<compile_context>
chip_gen: v5e
topology: v5e:2x2
jax: 0.10.0
libtpu: 0.0.40
codegen_flags: <defaults>
</compile_context>

<pallas_src>
import math
import functools

import jax
import jax.numpy as jnp
from jax.experimental import pallas as pl
from jax.experimental.pallas import tpu as pltpu

# Deterministic "parameters" of the proposal distribution (synthetic init, no checkpoint).
MU = 0.0
SIGMA = 1.0
SALT_FRACTION = 4  # self._salt_fraction

_ON_TPU = jax.default_backend() == "tpu"


def _recip(x):
    """Approx EUP reciprocal on a real TPU; exact divide elsewhere (interpret/CPU safe)."""
    if _ON_TPU:
        return pl.reciprocal(x, approx=True)
    return 1.0 / x


def _time_sampler_kernel(x_ref, t_ref, p_ref, *, rows1, block_rows, mu, sigma,
                         salt_k, needs_boundary):
    """One (block_rows, 128) tile. x holds z (proposal rows) or u (salted rows)."""
    x = x_ref[...]                       # (block_rows, 128) f32
    shape = x.shape
    norm_const = 1.0 / (sigma * math.sqrt(2.0 * math.pi))
    inv_sigma = 1.0 / sigma
    eps = 1e-6

    def proposal_tp(z):
        # t = sigmoid(mu + sigma*z); pdf straight from z (no clip/log round trip):
        #   1/(t*(1-t)) = (1+e)*(1+1/e) with e = exp(-(mu+sigma*z))
        xv = jnp.clip(mu + sigma * z, -30.0, 30.0)   # keeps e finite; no-op for real draws
        e = jnp.exp(-xv)
        s = 1.0 + e
        t = 1.0 / s                                   # exact: this is the returned sample
        pdf = norm_const * jnp.exp(-0.5 * z * z) * s * (1.0 + _recip(e))
        return t, pdf

    def salted_tp(u):
        # Salted tail: t = u ~ U(0,1); pdf needs the explicit logit (single log).
        tc = jnp.clip(u, eps, 1.0 - eps)
        one_m = 1.0 - tc
        zz = (jnp.log(tc * _recip(one_m)) - mu) * inv_sigma
        pdf = norm_const * jnp.exp(-0.5 * zz * zz) * _recip(tc * one_m)
        return u, pdf

    def emit(t, pdf):
        t_ref[...] = t
        p_ref[...] = pdf * (1.0 - salt_k) + salt_k    # salt mixing: p*(1-k) + k

    if salt_k == 0.0:                  # static: no salting at all -> single-path kernel
        emit(*proposal_tp(x))
        return

    i = pl.program_id(0)
    n_norm = rows1 - i * block_rows    # rows of this block drawn from the proposal

    @pl.when(n_norm >= block_rows)     # block entirely in the proposal region
    def _():
        emit(*proposal_tp(x))

    @pl.when(n_norm <= 0)              # block entirely in the salted tail
    def _():
        emit(*salted_tp(x))

    if needs_boundary:                 # static: only compiled when tiles don't align
        @pl.when(jnp.logical_and(n_norm > 0, n_norm < block_rows))
        def _():
            t_n, p_n = proposal_tp(x)
            t_s, p_s = salted_tp(x)
            sel = jax.lax.broadcasted_iota(jnp.int32, shape, 0) < n_norm
            emit(jnp.where(sel, t_n, t_s), jnp.where(sel, p_n, p_s))


def _choose_block_rows(rows, rows1, cap=2048):
    """Largest (8-multiple) divisor of rows <= cap, preferring salt-boundary alignment
    and >= 2 (even) grid steps so both v7x TensorCores are busy."""
    cands = [d for d in range(8, min(rows, cap) + 1, 8) if rows % d == 0]
    if not cands:
        return rows                    # rows < 8: single full-array block
    def score(br):
        steps = rows // br
        aligned = (rows1 % br == 0)    # no dual-path boundary block
        multi = steps >= 2
        even = (steps % 2 == 0)
        return (aligned, multi, even, br)
    return max(cands, key=score)


def time_sampler_forward(bs, key, *, salt_fraction=SALT_FRACTION, mu=MU, sigma=SIGMA,
                         block_rows=None):
    """Pallas-backed TimeSampler.forward(bs): returns (t, p), each shape (bs,), f32."""
    assert bs % 128 == 0, "bs must be a multiple of 128 (lane width)"
    rows = bs // 128
    if salt_fraction is not None:
        assert bs % salt_fraction == 0
        bs2 = bs // salt_fraction
        assert bs2 % 128 == 0, "salted tail must cover whole 128-lane rows"
        bs1 = bs - bs2
        salt_k = 1.0 / salt_fraction
    else:
        bs1, bs2, salt_k = bs, 0, 0.0
    rows1 = bs1 // 128

    # Host-side randomness (sample()'s z and the uniform salt draw), packed into one
    # lane-dense (rows, 128) stream; all arithmetic happens in the kernel.
    kz, ku = jax.random.split(key)
    parts = [jax.random.normal(kz, (bs1,), dtype=jnp.float32)]
    if bs2:
        parts.append(jax.random.uniform(ku, (bs2,), dtype=jnp.float32))
    x2d = jnp.concatenate(parts).reshape(rows, 128)

    if block_rows is None:
        block_rows = _choose_block_rows(rows, rows1)
    assert rows % block_rows == 0
    assert block_rows % 8 == 0 or block_rows == rows
    grid = (rows // block_rows,)
    needs_boundary = (salt_k != 0.0) and (rows1 % block_rows != 0)

    kernel = functools.partial(
        _time_sampler_kernel, rows1=rows1, block_rows=block_rows,
        mu=float(mu), sigma=float(sigma), salt_k=float(salt_k),
        needs_boundary=needs_boundary)

    blk = pl.BlockSpec((block_rows, 128), lambda i: (i, 0))
    out_sds = jax.ShapeDtypeStruct((rows, 128), jnp.float32)

    t2d, p2d = pl.pallas_call(
        kernel,
        grid=grid,
        in_specs=[blk],
        out_specs=(blk, blk),
        out_shape=(out_sds, out_sds),
        compiler_params=pltpu.CompilerParams(dimension_semantics=("parallel",)),
    )(x2d)

    return t2d.reshape(bs), p2d.reshape(bs)


# ---------------- pure-JAX reference (for correctness checks) ----------------
def _prob_ref(t, *, mu=MU, sigma=SIGMA):
    eps = 1e-6
    tc = jnp.clip(t, eps, 1.0 - eps)
    z = (jnp.log(tc) - jnp.log(1.0 - tc) - mu) / sigma
    return jnp.exp(-0.5 * z * z) / (sigma * math.sqrt(2.0 * math.pi) * tc * (1.0 - tc))


def _forward_ref(bs, key, *, salt_fraction, mu=MU, sigma=SIGMA):
    if salt_fraction is not None:
        bs2 = bs // salt_fraction
        bs1 = bs - bs2
        k = 1.0 / salt_fraction
    else:
        bs1, bs2, k = bs, 0, 0.0
    kz, ku = jax.random.split(key)
    z = jax.random.normal(kz, (bs1,), dtype=jnp.float32)
    t = jax.nn.sigmoid(mu + sigma * z)
    if bs2:
        t = jnp.concatenate([t, jax.random.uniform(ku, (bs2,), dtype=jnp.float32)])
    p = _prob_ref(t, mu=mu, sigma=sigma) * (1.0 - k) + k
    return t, p


if __name__ == "__main__":
    key = jax.random.PRNGKey(0)

    configs = [
        dict(bs=4096, salt_fraction=4),      # aligned tiles: pure proposal + pure salted blocks
        dict(bs=1024, salt_fraction=4),      # single mixed (boundary) block path
        dict(bs=1024, salt_fraction=None),   # no-salting path
        dict(bs=32768, salt_fraction=4),     # larger auto-selected tiles (block_rows=64, 4 steps)
    ]
    for cfg in configs:
        bs, sf = cfg["bs"], cfg["salt_fraction"]
        t, p = time_sampler_forward(bs, key, salt_fraction=sf)
        t = jax.block_until_ready(t)
        p = jax.block_until_ready(p)

        assert t.shape == (bs,) and p.shape == (bs,)
        assert bool(jnp.all(jnp.isfinite(t))) and bool(jnp.all(jnp.isfinite(p)))
        assert bool(jnp.all((t >= 0.0) & (t <= 1.0)))
        assert bool(jnp.all(p >= 0.0))

        # Full-forward consistency vs. pure-JAX reference (same host RNG stream).
        t_ref, p_ref = _forward_ref(bs, key, salt_fraction=sf)
        assert jnp.allclose(t, t_ref, atol=1e-5, rtol=1e-5), \
            float(jnp.max(jnp.abs(t - t_ref)))
        assert jnp.allclose(p, p_ref, atol=2e-2, rtol=2e-2), \
            float(jnp.max(jnp.abs(p - p_ref)))

        # prob/salt-mixing consistency recomputed from the returned t.
        k = 0.0 if sf is None else 1.0 / sf
        p_from_t = _prob_ref(t) * (1.0 - k) + k
        assert jnp.allclose(p, p_from_t, atol=2e-2, rtol=2e-2)

        # Determinism for a fixed key.
        t2, p2 = time_sampler_forward(bs, key, salt_fraction=sf)
        assert bool(jnp.all(t == t2)) and bool(jnp.all(p == p2))

    # TODO(synk): loss() (l2 / p^2 weighting) and torch.distributions/device plumbing are
    # trivial host-side elementwise glue and are not fused into this kernel.
    print("KERNEL_OK")
</pallas_src>

<mosaic_0001>
module attributes {stable_mosaic.version = 11 : i64} {
  func.func @_time_sampler_kernel(%arg0: i32, %arg1: memref<8x128xf32, #tpu.memory_space<vmem>>, %arg2: memref<8x128xf32, #tpu.memory_space<vmem>>, %arg3: memref<8x128xf32, #tpu.memory_space<vmem>>) attributes {dimension_semantics = [#tpu.dimension_semantics<parallel>], iteration_bounds = array<i64: 4>, scalar_prefetch = 0 : i64, scratch_operands = 0 : i64, tpu.core_type = #tpu.core_type<tc>, window_params = [{transform_indices = @transform_0, window_bounds = array<i64: 8, 128>}, {transform_indices = @transform_1, window_bounds = array<i64: 8, 128>}, {transform_indices = @transform_2, window_bounds = array<i64: 8, 128>}]} {
    %c0 = arith.constant 0 : index
    %c0_0 = arith.constant 0 : index
    %0 = vector.load %arg1[%c0, %c0_0] : memref<8x128xf32, #tpu.memory_space<vmem>>, vector<8x128xf32>
    %c8_i32 = arith.constant 8 : i32
    %1 = arith.muli %arg0, %c8_i32 : i32
    %c24_i32 = arith.constant 24 : i32
    %2 = arith.subi %c24_i32, %1 : i32
    %c8_i32_1 = arith.constant 8 : i32
    %3 = arith.cmpi sge, %2, %c8_i32_1 : i32
    %4 = arith.extui %3 : i1 to i32
    %c0_i32 = arith.constant 0 : i32
    %5 = arith.cmpi ne, %4, %c0_i32 : i32
    scf.if %5 {
      %cst = arith.constant 1.000000e+00 : f32
      %9 = vector.broadcast %cst : f32 to vector<8x128xf32>
      %10 = arith.mulf %9, %0 : vector<8x128xf32>
      %cst_4 = arith.constant 0.000000e+00 : f32
      %11 = vector.broadcast %cst_4 : f32 to vector<8x128xf32>
      %12 = arith.addf %11, %10 : vector<8x128xf32>
      %cst_5 = arith.constant -3.000000e+01 : f32
      %cst_6 = arith.constant 3.000000e+01 : f32
      %13 = vector.broadcast %cst_5 : f32 to vector<8x128xf32>
      %14 = arith.maximumf %13, %12 : vector<8x128xf32>
      %15 = vector.broadcast %cst_6 : f32 to vector<8x128xf32>
      %16 = arith.minimumf %15, %14 : vector<8x128xf32>
      %cst_7 = arith.constant 0.000000e+00 : f32
      %17 = vector.broadcast %cst_7 : f32 to vector<8x128xf32>
      %18 = arith.subf %17, %16 : vector<8x128xf32>
      %19 = math.exp %18 : vector<8x128xf32>
      %cst_8 = arith.constant 1.000000e+00 : f32
      %20 = vector.broadcast %cst_8 : f32 to vector<8x128xf32>
      %21 = arith.addf %20, %19 : vector<8x128xf32>
      %cst_9 = arith.constant 1.000000e+00 : f32
      %22 = vector.broadcast %cst_9 : f32 to vector<8x128xf32>
      %23 = arith.divf %22, %21 : vector<8x128xf32>
      %cst_10 = arith.constant -5.000000e-01 : f32
      %24 = vector.broadcast %cst_10 : f32 to vector<8x128xf32>
      %25 = arith.mulf %24, %0 : vector<8x128xf32>
      %26 = arith.mulf %25, %0 : vector<8x128xf32>
      %27 = math.exp %26 : vector<8x128xf32>
      %cst_11 = arith.constant 0.398942292 : f32
      %28 = vector.broadcast %cst_11 : f32 to vector<8x128xf32>
      %29 = arith.mulf %28, %27 : vector<8x128xf32>
      %30 = arith.mulf %29, %21 : vector<8x128xf32>
      %cst_12 = arith.constant 1.000000e+00 : f32
      %31 = vector.broadcast %cst_12 : f32 to vector<8x128xf32>
      %32 = arith.divf %31, %19 : vector<8x128xf32>
      %cst_13 = arith.constant 1.000000e+00 : f32
      %33 = vector.broadcast %cst_13 : f32 to vector<8x128xf32>
      %34 = arith.addf %33, %32 : vector<8x128xf32>
      %35 = arith.mulf %30, %34 : vector<8x128xf32>
      %c0_14 = arith.constant 0 : index
      %c0_15 = arith.constant 0 : index
      %36 = vector.load %arg2[%c0_14, %c0_15] : memref<8x128xf32, #tpu.memory_space<vmem>>, vector<8x128xf32>
      tpu.vector_store %arg2[%c0_14, %c0_15], %23 {strides = array<i32>} : memref<8x128xf32, #tpu.memory_space<vmem>>, vector<8x128xf32>,
      %cst_16 = arith.constant 7.500000e-01 : f32
      %37 = vector.broadcast %cst_16 : f32 to vector<8x128xf32>
      %38 = arith.mulf %35, %37 : vector<8x128xf32>
      %cst_17 = arith.constant 2.500000e-01 : f32
      %39 = vector.broadcast %cst_17 : f32 to vector<8x128xf32>
      %40 = arith.addf %38, %39 : vector<8x128xf32>
      %c0_18 = arith.constant 0 : index
      %c0_19 = arith.constant 0 : index
      %41 = vector.load %arg3[%c0_18, %c0_19] : memref<8x128xf32, #tpu.memory_space<vmem>>, vector<8x128xf32>
      tpu.vector_store %arg3[%c0_18, %c0_19], %40 {strides = array<i32>} : memref<8x128xf32, #tpu.memory_space<vmem>>, vector<8x128xf32>,
    } else {
    }
    %c0_i32_2 = arith.constant 0 : i32
    %6 = arith.cmpi sle, %2, %c0_i32_2 : i32
    %7 = arith.extui %6 : i1 to i32
    %c0_i32_3 = arith.constant 0 : i32
    %8 = arith.cmpi ne, %7, %c0_i32_3 : i32
    scf.if %8 {
      %cst = arith.constant 9.99999997E-7 : f32
      %cst_4 = arith.constant 0.999998986 : f32
      %9 = vector.broadcast %cst : f32 to vector<8x128xf32>
      %10 = arith.maximumf %9, %0 : vector<8x128xf32>
      %11 = vector.broadcast %cst_4 : f32 to vector<8x128xf32>
      %12 = arith.minimumf %11, %10 : vector<8x128xf32>
      %cst_5 = arith.constant 1.000000e+00 : f32
      %13 = vector.broadcast %cst_5 : f32 to vector<8x128xf32>
      %14 = arith.subf %13, %12 : vector<8x128xf32>
      %cst_6 = arith.constant 1.000000e+00 : f32
      %15 = vector.broadcast %cst_6 : f32 to vector<8x128xf32>
      %16 = arith.divf %15, %14 : vector<8x128xf32>
      %17 = arith.mulf %12, %16 : vector<8x128xf32>
      %18 = math.log %17 : vector<8x128xf32>
      %cst_7 = arith.constant 0.000000e+00 : f32
      %19 = vector.broadcast %cst_7 : f32 to vector<8x128xf32>
      %20 = arith.subf %18, %19 : vector<8x128xf32>
      %cst_8 = arith.constant 1.000000e+00 : f32
      %21 = vector.broadcast %cst_8 : f32 to vector<8x128xf32>
      %22 = arith.mulf %20, %21 : vector<8x128xf32>
      %cst_9 = arith.constant -5.000000e-01 : f32
      %23 = vector.broadcast %cst_9 : f32 to vector<8x128xf32>
      %24 = arith.mulf %23, %22 : vector<8x128xf32>
      %25 = arith.mulf %24, %22 : vector<8x128xf32>
      %26 = math.exp %25 : vector<8x128xf32>
      %cst_10 = arith.constant 0.398942292 : f32
      %27 = vector.broadcast %cst_10 : f32 to vector<8x128xf32>
      %28 = arith.mulf %27, %26 : vector<8x128xf32>
      %29 = arith.mulf %12, %14 : vector<8x128xf32>
      %cst_11 = arith.constant 1.000000e+00 : f32
      %30 = vector.broadcast %cst_11 : f32 to vector<8x128xf32>
      %31 = arith.divf %30, %29 : vector<8x128xf32>
      %32 = arith.mulf %28, %31 : vector<8x128xf32>
      %c0_12 = arith.constant 0 : index
      %c0_13 = arith.constant 0 : index
      %33 = vector.load %arg2[%c0_12, %c0_13] : memref<8x128xf32, #tpu.memory_space<vmem>>, vector<8x128xf32>
      tpu.vector_store %arg2[%c0_12, %c0_13], %0 {strides = array<i32>} : memref<8x128xf32, #tpu.memory_space<vmem>>, vector<8x128xf32>,
      %cst_14 = arith.constant 7.500000e-01 : f32
      %34 = vector.broadcast %cst_14 : f32 to vector<8x128xf32>
      %35 = arith.mulf %32, %34 : vector<8x128xf32>
      %cst_15 = arith.constant 2.500000e-01 : f32
      %36 = vector.broadcast %cst_15 : f32 to vector<8x128xf32>
      %37 = arith.addf %35, %36 : vector<8x128xf32>
      %c0_16 = arith.constant 0 : index
      %c0_17 = arith.constant 0 : index
      %38 = vector.load %arg3[%c0_16, %c0_17] : memref<8x128xf32, #tpu.memory_space<vmem>>, vector<8x128xf32>
      tpu.vector_store %arg3[%c0_16, %c0_17], %37 {strides = array<i32>} : memref<8x128xf32, #tpu.memory_space<vmem>>, vector<8x128xf32>,
    } else {
    }
    return
  }
  func.func @transform_0(%arg0: i32) -> (i32, i32) {
    %c0_i32 = arith.constant 0 : i32
    %c0_i32_0 = arith.constant 0 : i32
    return %arg0, %c0_i32 : i32, i32
  }
  func.func @transform_1(%arg0: i32) -> (i32, i32) {
    %c0_i32 = arith.constant 0 : i32
    %c0_i32_0 = arith.constant 0 : i32
    return %arg0, %c0_i32 : i32, i32
  }
  func.func @transform_2(%arg0: i32) -> (i32, i32) {
    %c0_i32 = arith.constant 0 : i32
    %c0_i32_0 = arith.constant 0 : i32
    return %arg0, %c0_i32 : i32, i32
  }
}

</mosaic_0001>

<bundles_post_ra>
// kernel: tpu_custom_call.1
= control target key start
LH: loop header
LB: loop body
LE: loop exit
PB: predicated region body
PF: predicated region fallthrough
CT: control target
= control target key end

     0   :  { %8 = vsyncpa [#allocation3], 0  ;;  %s806_s0 = inlined_call_operand.hbm [shape: f32[32,128], index: 0, kind: input, shape index: {}]   ;;  %s807_s1 = inlined_call_operand.hbm [shape: f32[32,128], index: 1, kind: output, shape index: {0}]   ;;  %s808_s2 = inlined_call_operand.hbm [shape: f32[32,128], index: 2, kind: output, shape index: {1}]  }
   0x1   :  { %10 = vsyncpa [#allocation3 + $0x1], 0 }
   0x2   :  { %11 = vsyncpa [#allocation4], 0 }
   0x3   :  { %13 = vsyncpa [#allocation4 + $0x1], 0 }
   0x4   :  { %14 = vsyncpa [#allocation7], 0 }
   0x5   :  { %16 = vsyncpa [#allocation7 + $0x1], 0  ;;  %s648_s9 = smov 0   ;;  %s650_s10 = smov 0  }
   0x6   :  { %s652_s11 = smov 0   ;;  %s654_s12 = smov 0  }
   0x7 LB: > { %s669_s13 = sadd.s32 4294967295, %s631_s12   ;;  %s417_s14 = sadd.s32 4294967294, %s631_s12   ;;  %s631_s12 = sphi %s654_s12, %s817_s12   ;;  %s627_s11 = sphi %s652_s11, %s816_s11   ;;  %s623_s10 = sphi %s650_s10, %s815_s10   ;;  %s619_s9 = sphi %s648_s9, %s814_s9  }
   0x8   : > { %s673_s15 = sadd.s32 1, %s631_s12   ;;  %s29_s16 = sadd.s32 1, %s627_s11 }
   0x9   : > { %s26_s17 = ssub.s32 %s631_s12, %s673_s15  ;;  %p36_p0 = scmp.ne.s32.totalorder %s627_s11, %s623_s10 }
   0xa   : > { %p27_p1 = scmp.eq.s32.totalorder %s26_s17, 0  ;;  %p37_p2 = scmp.eq.s32.totalorder %s631_s12, 0 }
   0xb   : > { %p42_p3 = scmp.ne.s32.totalorder %s623_s10, %s619_s9  ;;  %p43_p4 = scmp.eq.s32.totalorder %s669_s13, 0 }
   0xc   : > { %s685_s18 = scalar_select %p27_p1, %s627_s11, %s29_s16  }
   0xd   : > { %p687_p5 = por %p37_p2, %p36_p0  ;;  %p691_p6 = por %p43_p4, %p42_p3 }
   0xe   : > { %p66_p7 = scmp.eq.s32.totalorder %s669_s13, 3  ;;  %p72_p8 = scmp.eq.s32.totalorder %s417_s14, 3 }
   0xf   : > { %p453_p9 = scmp.lt.s32.totalorder %s631_s12, 4  ;;  %s118_s23 = sand.u32 1, %s627_s11  }
  0x10   : > { %p697_p10 = por %p66_p7, %p36_p0  ;;  %p701_p11 = por %p72_p8, %p42_p3 }
  0x11   : > { %s421_s24 = sshll.u32 %s631_s12, 3  ;;  %s420_s25 = sshll.u32 %s118_s23, 3 }
  0x12   : > { %s126_s28 = scalar_lea.hbm %s806_s0, %s421_s24  ;;  %s122_s30 = scalar_lea.vmem [#allocation2], %s420_s25 }
  0x13   : > { %s128_s29 = sshll.u32 %s126_s28, 4  ;;  %s130_s3 = sshll.u32 %s122_s30, 4  ;;  %s129_s29 = int_to_ptr.hbm [resolvable:$true] %s128_s29  ;;  %s131_s3 = int_to_ptr.vmem [resolvable:$true] %s130_s3 }
  0x14   : > { %p712_p12 = pnand %p453_p9, %p687_p5  ;;  %p422_p13 = scmp.ge.s32.totalorder %s631_s12, 1 }
  0x15   : > { %p135_p0 = scmp.lt.s32.totalorder %s631_s12, 5  ;;  %s119_s5 = scalar_lea.sflag [#allocation3], %s118_s23 }
  0x16   : > { %s503_s6 = sshra.s32 %s129_s29, 4  ;;  %p507_p2 = pneg %p712_p12  ;;  %s504_s6 = int_to_ptr.hbm [resolvable:$true] %s503_s6 }
  0x17   : > { %s505_s7 = scalar_lea.hbm %s504_s6, 8  ;;  %s510_s16 = scalar_lea.hbm %s806_s0, 32 }
  0x18   : > { %p506_p1 = scmp.ne.s32.totalorder %s504_s6, %s505_s7  ;;  %p511_p5 = scmp.lt.s32.totalorder %s504_s6, %s806_s0 }
  0x19   : > { %p512_p7 = scmp.lt.s32.totalorder %s510_s16, %s505_s7 }
  0x1a   : > { %p508_p3 = pnand %p507_p2, %p506_p1 }
  0x1b   : > { %p513_p8 = por %p512_p7, %p511_p5 }
  0x1c   : > { %p509_p4 = pneg %p508_p3 }
  0x1e   : > { %p514_p9 = pnand %p513_p8, %p509_p4 }
  0x20   : > { %517 = shalt.err (!%p514_p9)
}
  0x21   : > { %445 = dma.hbm_to_vmem [thread:$0]  (!%p712_p12), %s129_s29, 128, %s131_s3, %s119_s5  }
  0x22   : > { %p136_p1 = pnand %p422_p13, %p135_p0 }
  0x23   : > { %s733_s23 = sand.u32 (!%p136_p1), 1, %s623_s10  }
  0x24   : > { %139 = sbr.rel (%p136_p1) target bundleno = 181 (0xb5), region = 24  ;;  %s423_s24 = sshll.u32 (!%p136_p1), %s733_s23, 3 }
  0x25   : > { %s142_s25 = scalar_lea.sflag (!%p136_p1), [#allocation3], %s733_s23  ;;  %s145_s26 = scalar_lea.vmem (!%p136_p1), [#allocation2], %s423_s24 }
  0x29   : > { %606 = dma.done.wait (%p691_p6), %s142_s25, 128  }
  0x2a   : > { %608 = vsyncadd (%p691_p6), %s142_s25, 4294967168  ;;  %s742_s27 = sshll.u32 %s669_s13, 3  ;;  %v172_v0 = vld [vmem:[%s145_s26] sm:$0xff]  ;;  %s745_s29 = scalar_lea.vmem [#allocation5], %s423_s24 }
  0x2b   : > { %s174_s28 = ssub.s32 24, %s742_s27  ;;  %s747_s30 = scalar_lea.vmem [#allocation6], %s423_s24 }
  0x2c   : > { %p427_p12 = scmp.lt.s32.totalorder %s174_s28, 8 }
  0x2e   : > { %178 = sbr.rel (%p427_p12) target bundleno = 90 (0x5a), region = 32 }
  0x33   : > { %v428_v1 = vclamps-f32 %v172_v0, 30.0  ;;  %v201_v3 = vmul.f32 -0.5, %v172_v0 }
  0x35   : > { %v182_v2 = vsub.f32 0.0, %v428_v1  ;;  %v202_v5 = vmul.f32 %v201_v3, %v172_v0 }
  0x37   : > { %v183_v4 = vmul.f32 1.442695, %v182_v2  ;;  %v203_v6 = vmul.f32 1.442695, %v202_v5 }
  0x39   : > { %487 = vpow2.f32 %v183_v4 }
  0x3f   : > { %v488_v7 = vpop.eup %487 }
  0x40   : > { %v185_v8 = vadd.f32 1.0, %v488_v7  ;;  %489 = vrcp.f32 %v488_v7  ;;  %vm212_vm0 = vweird.f32 %v488_v7  ;;  %v218_v13 = vand.u32 2147483648, %v488_v7 }
  0x41   : > { %491 = vpow2.f32 %v203_v6  ;;  %v216_v16 = vand.u32 2147483647, %v488_v7 }
  0x42   : > { %493 = vrcp.f32 %v185_v8  ;;  %vm191_vm2 = vweird.f32 %v185_v8  ;;  %v197_v17 = vand.u32 2147483648, %v185_v8  ;;  %v195_v20 = vand.u32 2147483647, %v185_v8 }
  0x43   : > { %v219_v22 = vor.u32 1.1754944e-38, %v218_v13  ;;  %vm217_vm5 = vcmp.eq.f32.partialorder %v216_v16, 8.507059e+37 }
  0x44   : > { %v198_v25 = vor.u32 1.1754944e-38, %v197_v17  ;;  %vm196_vm7 = vcmp.eq.f32.partialorder %v195_v20, 8.507059e+37 }
  0x46   : > { %v490_v9 = vpop.eup %489 }
  0x47   : > { %v492_v10 = vpop.eup %491  ;;  %v208_v11 = vmul.f32 %v490_v9, %v488_v7  ;;  %vm213_vm1 = vweird.f32 %v490_v9 }
  0x48   : > { %v494_v12 = vpop.eup %493  ;;  %v205_v18 = vmul.f32 0.3989423, %v492_v10  ;;  %vm214_vm4 = vmor %vm212_vm0, %vm213_vm1 }
  0x49   : > { %v187_v14 = vmul.f32 %v494_v12, %v185_v8  ;;  %v209_v15 = vsub.f32 1.0, %v208_v11  ;;  %vm192_vm3 = vweird.f32 %v494_v12 }
  0x4a   : > { %vm193_vm6 = vmor %vm191_vm2, %vm192_vm3  ;;  %v206_v27 = vmul.f32 %v205_v18, %v185_v8 }
  0x4b   : > { %v188_v19 = vsub.f32 1.0, %v187_v14  ;;  %v210_v21 = vmul.f32 %v490_v9, %v209_v15 }
  0x4d   : > { %v189_v23 = vmul.f32 %v494_v12, %v188_v19  ;;  %v211_v24 = vadd.f32 %v490_v9, %v210_v21 }
  0x4f   : > { %v190_v26 = vadd.f32 %v494_v12, %v189_v23  ;;  %v215_v28 = vsel %vm214_vm4, %v490_v9, %v211_v24 }
  0x50   : > { %v220_v29 = vsel %vm217_vm5, %v219_v22, %v215_v28 }
  0x51   : > { %v194_v30 = vsel %vm193_vm6, %v494_v12, %v190_v26  ;;  %v222_v31 = vadd.f32 1.0, %v220_v29 }
  0x52   : > { %v199_v32 = vsel %vm196_vm7, %v198_v25, %v194_v30 }
  0x53   : > { %224 = vst [vmem:[%s745_s29] sm:$0xff] %v199_v32  ;;  %v223_v33 = vmul.f32 %v222_v31, %v206_v27 }
  0x55   : > { %v225_v34 = vmul.f32 0.75, %v223_v33 }
  0x57   : > { %v226_v35 = vadd.f32 0.25, %v225_v34 }
  0x59   : > { %227 = vst [vmem:[%s747_s30] sm:$0xff] %v226_v35 }
  0x5a PF: > { %p429_p6 = scmp.gt.s32.totalorder %s174_s28, 0 }
  0x5c   : > { %231 = sbr.rel (%p429_p6) target bundleno = 153 (0x99), region = 36 }
  0x61   : > { %275 = vst [vmem:[%s745_s29] sm:$0xff] %v172_v0  ;;  %v232_v36 = vmax.f32 %v172_v0, 1e-06 }
  0x63   : > { %v233_v37 = vmin.f32 %v232_v36, 0.999999 }
  0x65   : > { %v234_v38 = vsub.f32 1.0, %v233_v37 }
  0x67   : > { %495 = vrcp.f32 %v234_v38  ;;  %v246_v41 = vand.u32 2147483648, %v234_v38  ;;  %v258_v42 = vmul.f32 %v234_v38, %v233_v37  ;;  %vm240_vm8 = vweird.f32 %v234_v38 }
  0x68   : > { %v244_v44 = vand.u32 2147483647, %v234_v38 }
  0x69   : > { %v247_v46 = vor.u32 1.1754944e-38, %v246_v41  ;;  %497 = vrcp.f32 %v258_v42  ;;  %vm264_vm12 = vweird.f32 %v258_v42  ;;  %v270_v60 = vand.u32 2147483648, %v258_v42 }
  0x6a   : > { %vm245_vm11 = vcmp.eq.f32.partialorder %v244_v44, 8.507059e+37  ;;  %v268_v62 = vand.u32 2147483647, %v258_v42 }
  0x6b   : > { %v271_v63 = vor.u32 1.1754944e-38, %v270_v60 }
  0x6c   : > { %vm269_vm15 = vcmp.eq.f32.partialorder %v268_v62, 8.507059e+37 }
  0x6d   : > { %v496_v39 = vpop.eup %495 }
  0x6e   : > { %v236_v40 = vmul.f32 %v496_v39, %v234_v38  ;;  %vm241_vm9 = vweird.f32 %v496_v39 }
  0x6f   : > { %vm242_vm10 = vmor %vm240_vm8, %vm241_vm9  ;;  %v498_v51 = vpop.eup %497 }
  0x70   : > { %v237_v43 = vsub.f32 1.0, %v236_v40  ;;  %v260_v52 = vmul.f32 %v498_v51, %v258_v42  ;;  %vm265_vm13 = vweird.f32 %v498_v51 }
  0x71   : > { %vm266_vm14 = vmor %vm264_vm12, %vm265_vm13 }
  0x72   : > { %v238_v45 = vmul.f32 %v496_v39, %v237_v43  ;;  %v261_v54 = vsub.f32 1.0, %v260_v52 }
  0x74   : > { %v239_v47 = vadd.f32 %v496_v39, %v238_v45  ;;  %v262_v57 = vmul.f32 %v498_v51, %v261_v54 }
  0x76   : > { %v243_v48 = vsel %vm242_vm10, %v496_v39, %v239_v47  ;;  %v263_v61 = vadd.f32 %v498_v51, %v262_v57 }
  0x77   : > { %v248_v49 = vsel %vm245_vm11, %v247_v46, %v243_v48 }
  0x78   : > { %v250_v50 = vmul.f32 %v248_v49, %v233_v37  ;;  %v267_v0 = vsel %vm266_vm14, %v498_v51, %v263_v61 }
  0x79   : > { %v272_v2 = vsel %vm269_vm15, %v271_v63, %v267_v0 }
  0x7a   : > { %499 = vlog2.f32 %v250_v50 }
  0x80   : > { %v500_v53 = vpop.eup %499 }
  0x81   : > { %v252_v55 = vmul.f32 0.6931472, %v500_v53 }
  0x83   : > { %v253_v56 = vmul.f32 -0.5, %v252_v55 }
  0x85   : > { %v254_v58 = vmul.f32 %v253_v56, %v252_v55 }
  0x87   : > { %v255_v59 = vmul.f32 1.442695, %v254_v58 }
  0x89   : > { %501 = vpow2.f32 %v255_v59 }
  0x8f   : > { %v502_v1 = vpop.eup %501 }
  0x90   : > { %v257_v3 = vmul.f32 0.3989423, %v502_v1 }
  0x92   : > { %v274_v4 = vmul.f32 %v272_v2, %v257_v3 }
  0x94   : > { %v276_v5 = vmul.f32 0.75, %v274_v4 }
  0x96   : > { %v277_v6 = vadd.f32 0.25, %v276_v5 }
  0x98   : > { %278 = vst [vmem:[%s747_s30] sm:$0xff] %v277_v6 }
  0x99 PF: > { %s295_s3 = scalar_lea.hbm %s807_s1, %s742_s27  ;;  %s297_s4 = sshll.u32 %s745_s29, 4  ;;  %s298_s4 = int_to_ptr.vmem [resolvable:$true] %s297_s4 }
  0x9a   : > { %s299_s5 = sshll.u32 %s295_s3, 4  ;;  %s280_s6 = scalar_lea.sflag [#allocation4], %s733_s23  ;;  %s300_s5 = int_to_ptr.hbm [resolvable:$true] %s299_s5 }
  0x9b   : > { %s547_s7 = sshra.s32 %s300_s5, 4  ;;  %s553_s17 = scalar_lea.hbm %s807_s1, 32  ;;  %s548_s7 = int_to_ptr.hbm [resolvable:$true] %s547_s7 }
  0x9c   : > { %s549_s8 = scalar_lea.hbm %s548_s7, 8  ;;  %p554_p3 = scmp.lt.s32.totalorder %s548_s7, %s807_s1 }
  0x9d   : > { %p550_p13 = scmp.ne.s32.totalorder %s548_s7, %s549_s8  ;;  %p555_p4 = scmp.lt.s32.totalorder %s553_s17, %s549_s8 }
  0x9f   : > { %p551_p0 = pnand %p550_p13, %p697_p10  ;;  %p556_p5 = por %p555_p4, %p554_p3 }
  0xa1   : > { %p552_p2 = pneg %p551_p0 }
  0xa3   : > { %p557_p7 = pnand %p556_p5, %p552_p2 }
  0xa5   : > { %560 = shalt.err (!%p557_p7)
}
  0xa6   : > { %438 = dma.vmem_to_hbm [thread:$0]  (%p697_p10), %s298_s4, 128, %s300_s5, %s280_s6  }
  0xa7   : > { %s309_s28 = scalar_lea.hbm %s808_s2, %s742_s27  ;;  %s311_s29 = sshll.u32 %s747_s30, 4  ;;  %s312_s29 = int_to_ptr.vmem [resolvable:$true] %s311_s29 }
  0xa8   : > { %s313_s13 = sshll.u32 %s309_s28, 4  ;;  %s285_s20 = scalar_lea.sflag [#allocation7], %s733_s23  ;;  %s314_s13 = int_to_ptr.hbm [resolvable:$true] %s313_s13 }
  0xa9   : > { %s575_s3 = sshra.s32 %s314_s13, 4  ;;  %s581_s4 = scalar_lea.hbm %s808_s2, 32  ;;  %s576_s3 = int_to_ptr.hbm [resolvable:$true] %s575_s3 }
  0xaa   : > { %s577_s7 = scalar_lea.hbm %s576_s3, 8  ;;  %p582_p12 = scmp.lt.s32.totalorder %s576_s3, %s808_s2 }
  0xab   : > { %p578_p8 = scmp.ne.s32.totalorder %s576_s3, %s577_s7  ;;  %p583_p6 = scmp.lt.s32.totalorder %s581_s4, %s577_s7 }
  0xad   : > { %p579_p9 = pnand %p578_p8, %p697_p10  ;;  %p584_p13 = por %p583_p6, %p582_p12 }
  0xaf   : > { %p580_p1 = pneg %p579_p9 }
  0xb1   : > { %p585_p0 = pnand %p584_p13, %p580_p1 }
  0xb3   : > { %588 = shalt.err (!%p585_p0)
}
  0xb4   : > { %439 = dma.vmem_to_hbm [thread:$0]  (%p697_p10), %s312_s29, 128, %s314_s13, %s285_s20  }
  0xb5 PF: > { %p454_p2 = scmp.ge.s32.totalorder %s631_s12, 2  ;;  %s325_s23 = sand.u32 1, %s619_s9  }
  0xb6   : > { %s326_s27 = scalar_lea.sflag [#allocation4], %s325_s23 }
  0xb7   : > { %p447_p3 = pnand %p454_p2, %p701_p11 }
  0xb9   : > { %p448_p4 = pneg %p447_p3 }
  0xbb   : > { %610 = dma.done.wait (%p448_p4), %s326_s27, 128  }
  0xbc   : > { %612 = vsyncadd (%p448_p4), %s326_s27, 4294967168  ;;  %s336_s30 = scalar_lea.sflag [#allocation7], %s325_s23 }
  0xbd   : > { %614 = dma.done.wait (%p448_p4), %s336_s30, 128  }
  0xbe   : > { %616 = vsyncadd (%p448_p4), %s336_s30, 4294967168  ;;  %p19_p10 = scmp.ge.s32.totalorder %s673_s15, 6   ;;  %s814_s9 = smov %s623_s10 }
  0xbf   : > { %s815_s10 = smov %s627_s11  ;;  %s816_s11 = smov %s685_s18 }
  0xc0   : > { %s817_s12 = smov %s673_s15  ;;  %21 = sbr.rel (!%p19_p10) target bundleno = 7 (0x7), region = 94 }
  0xc5   :  { %342 = vsyncpa [#allocation3], 1 }
  0xc6   :  { %344 = vsyncpa [#allocation3 + $0x1], 1 }
  0xc7   :  { %345 = vsyncpa [#allocation4], 1 }
  0xc8   :  { %347 = vsyncpa [#allocation4 + $0x1], 1 }
  0xc9   :  { %348 = vsyncpa [#allocation7], 1 }
  0xca   :  { %350 = vsyncpa [#allocation7 + $0x1], 1 }

</bundles_post_ra>
